<compile_context>
chip_gen: v7x
topology: tpu7x:2x2x1
jax: 0.10.0
libtpu: 0.0.40
codegen_flags: <defaults>
</compile_context>

<pallas_src>
import math

import jax
import jax.numpy as jnp
from jax.experimental import pallas as pl
from jax.experimental.pallas import tpu as pltpu


# -----------------------------------------------------------------------------
# VMEM budgeting (gate tiles / resident-XW on the actual chip: 64 MiB per TC on
# v7x, 128 MiB on v5e/v6e).
# -----------------------------------------------------------------------------
_DEFAULT_VMEM_CAP = 64 * 1024 * 1024  # conservative fallback (v7x per-TC size)


def _vmem_capacity_bytes():
    try:
        cap = int(getattr(pltpu.get_tpu_info(), "vmem_capacity_bytes", 0))
        if cap > 0:
            return cap
    except Exception:
        pass
    return _DEFAULT_VMEM_CAP


_VMEM_CAP = _vmem_capacity_bytes()
# Scoped limit we request from the compiler, and the smaller budget we plan
# steady-state buffers against (headroom for compiler temporaries / spills).
_VMEM_LIMIT_BYTES = min(3 * _VMEM_CAP // 4, 96 * 1024 * 1024)
_VMEM_PLAN_BYTES = min(_VMEM_CAP // 2, 64 * 1024 * 1024)


def _round_up(x, m):
    return ((x + m - 1) // m) * m


# -----------------------------------------------------------------------------
# Path A: fully fused forward (single pallas_call) for graphs that fit VMEM.
# All layers are computed back to back in VMEM: no HBM round trips for XW or
# the intermediate activations, one kernel launch total.
# -----------------------------------------------------------------------------
def _make_fused_forward_kernel(num_layers):
    def kernel(*refs):
        a_ref = refs[0]                      # (N, N)   bf16
        x_ref = refs[1]                      # (N, F0)  bf16
        w_refs = refs[2:2 + num_layers]      # (Fi, Fi+1) bf16 each
        o_ref = refs[2 + num_layers]         # (N, F_last)

        a = a_ref[...]
        h_bf16 = x_ref[...]
        h_f32 = None
        for w_ref in w_refs:
            xw = jnp.dot(h_bf16, w_ref[...], preferred_element_type=jnp.float32)
            h_f32 = jnp.maximum(
                jnp.dot(a, xw.astype(jnp.bfloat16),
                        preferred_element_type=jnp.float32),
                0.0)
            h_bf16 = h_f32.astype(jnp.bfloat16)
        o_ref[...] = h_f32.astype(o_ref.dtype)

    return kernel


def _fused_vmem_estimate(n, feats, out_bytes=4):
    b = n * n * 2                                   # A bf16
    b += n * feats[0] * 2                           # X bf16
    b += sum(feats[i] * feats[i + 1] * 2 for i in range(len(feats) - 1))
    b += n * feats[-1] * out_bytes                  # output
    b += 4 * n * max(feats) * 4                     # live f32 temporaries
    return b


def _fused_forward(ahat_bf16, x, w_list, out_dtype=jnp.float32):
    n = ahat_bf16.shape[0]
    f_out = w_list[-1].shape[1]
    args = (ahat_bf16, x.astype(jnp.bfloat16)) + tuple(
        w.astype(jnp.bfloat16) for w in w_list)
    return pl.pallas_call(
        _make_fused_forward_kernel(len(w_list)),
        out_shape=jax.ShapeDtypeStruct((n, f_out), out_dtype),
        compiler_params=pltpu.CompilerParams(
            vmem_limit_bytes=_VMEM_LIMIT_BYTES),
    )(*args)


# -----------------------------------------------------------------------------
# Path B (large N): tiled per-layer kernels.
# -----------------------------------------------------------------------------
def _xw_kernel(x_ref, w_ref, o_ref):
    o_ref[...] = jnp.dot(
        x_ref[...], w_ref[...], preferred_element_type=jnp.float32
    ).astype(o_ref.dtype)


def _xw_matmul(x, w, *, tm_max=512):
    """XW = X @ W, row-tiled; computed exactly once per layer."""
    n, f_in = x.shape
    _, f_out = w.shape
    tm = n
    for cand in (tm_max, 512, 256, 128, 64, 32, 16):  # 16-aligned (bf16 sublanes)
        if cand <= tm_max and cand <= n and n % cand == 0:
            tm = cand
            break
    return pl.pallas_call(
        _xw_kernel,
        out_shape=jax.ShapeDtypeStruct((n, f_out), jnp.bfloat16),
        grid_spec=pltpu.PrefetchScalarGridSpec(
            num_scalar_prefetch=0,
            grid=(n // tm,),
            in_specs=[
                pl.BlockSpec((tm, f_in), lambda i: (i, 0)),      # X row-block
                pl.BlockSpec((f_in, f_out), lambda i: (0, 0)),   # full W
            ],
            out_specs=pl.BlockSpec((tm, f_out), lambda i: (i, 0)),
        ),
        compiler_params=pltpu.CompilerParams(
            dimension_semantics=("parallel",),
            vmem_limit_bytes=_VMEM_LIMIT_BYTES,
        ),
    )(x, w)


def _make_a_xw_kernel(xw_resident, tk):
    def kernel(a_ref, xw_ref, o_ref, acc_ref):
        k = pl.program_id(1)

        @pl.when(k == 0)
        def _init():
            acc_ref[...] = jnp.zeros_like(acc_ref)

        if xw_resident:
            # XW lives fully in VMEM (constant block index -> single DMA);
            # slice the current reduction chunk out of it.
            off = pl.multiple_of(k * tk, tk)
            xw_blk = xw_ref[pl.ds(off, tk), :]
        else:
            xw_blk = xw_ref[...]

        acc_ref[...] += jnp.dot(a_ref[...], xw_blk,
                                preferred_element_type=jnp.float32)

        @pl.when(k == pl.num_programs(1) - 1)
        def _finalize():
            o_ref[...] = jnp.maximum(acc_ref[...], 0.0).astype(o_ref.dtype)

    return kernel


def _a_xw_relu(ahat, xw, *, out_dtype, tm_max=512, tk_max=1024):
    """out = relu(A @ XW), K-tiled with f32 VMEM accumulator, XW resident when it fits."""
    n = ahat.shape[0]
    f_out = xw.shape[1]
    out_bytes = jnp.dtype(out_dtype).itemsize

    def _pick(maxv):
        for cand in (maxv, 1024, 512, 256, 128, 64, 32, 16):
            if cand <= maxv and cand <= n and n % cand == 0:
                return cand
        return n

    tm = _pick(tm_max)   # row block (sublane axis; all candidates 16-aligned)
    tk = _pick(tk_max)   # reduction block (lane axis; multiples of 128)

    # Keep >=2 row blocks when possible so the "parallel" row axis can split
    # across the two TensorCores on v7x (free on v5e/v6e).
    if n // tm < 2 and n >= 2 * 256:
        tm = _pick(max(256, (n // 2) // 16 * 16))

    # Resident-XW gating: 2 pipeline buffers for XW (index never changes so it
    # is DMA'd once, but the allocation is still 2x), 2x A blocks, 2x out
    # blocks, plus the f32 accumulator.
    resident_bytes = (2 * n * f_out * 2 + 2 * tm * tk * 2
                      + 2 * tm * f_out * out_bytes + tm * f_out * 4)
    xw_resident = resident_bytes <= _VMEM_PLAN_BYTES

    if xw_resident:
        xw_spec = pl.BlockSpec((n, f_out), lambda i, k: (0, 0))     # full, resident
    else:
        xw_spec = pl.BlockSpec((tk, f_out), lambda i, k: (k, 0))    # blocked fallback

    return pl.pallas_call(
        _make_a_xw_kernel(xw_resident, tk),
        out_shape=jax.ShapeDtypeStruct((n, f_out), out_dtype),
        grid_spec=pltpu.PrefetchScalarGridSpec(
            num_scalar_prefetch=0,
            grid=(n // tm, n // tk),   # rows (parallel) leading, reduction last
            in_specs=[pl.BlockSpec((tm, tk), lambda i, k: (i, k)), xw_spec],
            out_specs=pl.BlockSpec((tm, f_out), lambda i, k: (i, 0)),
            scratch_shapes=[pltpu.VMEM((tm, f_out), jnp.float32)],
        ),
        compiler_params=pltpu.CompilerParams(
            dimension_semantics=("parallel", "arbitrary"),
            vmem_limit_bytes=_VMEM_LIMIT_BYTES,
        ),
    )(ahat, xw)


# -----------------------------------------------------------------------------
# Sp_GCN forward
# -----------------------------------------------------------------------------
def sp_gcn_forward(A_list, Nodes_list, nodes_mask_list, w_list,
                   *, force_tiled=False, tm_max=512, tk_max=1024):
    """Mirrors Sp_GCN.forward (activation = ReLU):
       last_l = relu(Ahat @ (last_l @ W_i)) for each layer, Ahat = A_list[-1]."""
    del nodes_mask_list  # unused by the reference forward (kept for parity)
    x = Nodes_list[-1]
    ahat = A_list[-1]
    n = ahat.shape[0]
    feats = [x.shape[1]] + [w.shape[1] for w in w_list]

    use_fused = (not force_tiled) and (
        _fused_vmem_estimate(n, feats) <= _VMEM_PLAN_BYTES // 2)

    if use_fused:
        return _fused_forward(ahat.astype(jnp.bfloat16), x, w_list)

    # Tiled path: pad N to a multiple of 256 so tiles always divide the arrays.
    # Zero padding is exact: padded X rows are zero => padded XW rows are zero
    # => padded A columns contribute nothing; padded output rows are sliced off.
    n_pad = max(_round_up(n, 256), 256)
    if n_pad != n:
        ahat = jnp.pad(ahat, ((0, n_pad - n), (0, n_pad - n)))
        x = jnp.pad(x, ((0, n_pad - n), (0, 0)))
    ahat_bf16 = ahat.astype(jnp.bfloat16)  # halve HBM traffic on the dominant A read

    last_l = x.astype(jnp.bfloat16)
    for i, w in enumerate(w_list):
        is_last = i == len(w_list) - 1
        xw = _xw_matmul(last_l, w.astype(jnp.bfloat16), tm_max=tm_max)
        last_l = _a_xw_relu(
            ahat_bf16, xw,
            out_dtype=jnp.float32 if is_last else jnp.bfloat16,
            tm_max=tm_max, tk_max=tk_max)
    return last_l[:n]


def reset_param(key, shape):
    """Deterministic stand-in for u.reset_param: U(-1/sqrt(fan_out), 1/sqrt(fan_out))."""
    stdv = 1.0 / math.sqrt(shape[1])
    return jax.random.uniform(key, shape, jnp.float32, minval=-stdv, maxval=stdv)


def _reference_forward(ahat, x, w_list):
    """Pure-JAX reference emulating the same bf16 operand rounding / f32 accumulation."""
    def _bf16(v):
        return v.astype(jnp.bfloat16).astype(jnp.float32)

    a_r = _bf16(ahat)
    ref = x
    for w in w_list:
        xw = _bf16(jnp.dot(_bf16(ref), _bf16(w), preferred_element_type=jnp.float32))
        ref = jnp.maximum(jnp.dot(a_r, xw, preferred_element_type=jnp.float32), 0.0)
    return ref


if __name__ == "__main__":
    key = jax.random.PRNGKey(0)

    def make_inputs(k, n, feats):
        ks = jax.random.split(k, 1 + len(feats))
        a_raw = jax.random.uniform(ks[0], (n, n), jnp.float32)
        ahat = a_raw / jnp.sum(a_raw, axis=1, keepdims=True)  # dense row-normalized Ahat stand-in
        x = jax.random.normal(ks[1], (n, feats[0]), jnp.float32)
        ws = [reset_param(ks[2 + i], (feats[i], feats[i + 1]))
              for i in range(len(feats) - 1)]
        return ahat, x, ws

    # num_hidden_layers = 2, feats_per_node = 32, hidden_feats = [128, 128]
    feats = [32, 128, 128]
    k1, k2 = jax.random.split(key)

    # --- Check 1: demo size (N=128) -> fully fused single-pallas_call path.
    N1 = 128
    ahat, x, w_list = make_inputs(k1, N1, feats)
    out = sp_gcn_forward([ahat], [x], [jnp.ones((N1,), jnp.float32)], w_list)
    out = jax.block_until_ready(out)
    ref = _reference_forward(ahat, x, w_list)
    assert out.shape == (N1, feats[-1]) and out.dtype == jnp.float32
    assert jnp.allclose(out, ref, atol=2e-3, rtol=2e-3), "fused path mismatch"

    # --- Check 2: force the large-N tiled path (padding, K-tiled accumulator,
    #              VMEM-resident XW) at a small size with small tiles.
    N2 = 384
    ahat2, x2, w_list2 = make_inputs(k2, N2, feats)
    out2 = sp_gcn_forward([ahat2], [x2], [jnp.ones((N2,), jnp.float32)], w_list2,
                          force_tiled=True, tm_max=256, tk_max=256)
    out2 = jax.block_until_ready(out2)
    ref2 = _reference_forward(ahat2, x2, w_list2)
    assert out2.shape == (N2, feats[-1]) and out2.dtype == jnp.float32
    assert jnp.allclose(out2, ref2, atol=2e-3, rtol=2e-3), "tiled path mismatch"

    print("KERNEL_OK")
</pallas_src>

<mosaic_0001>
module attributes {stable_mosaic.version = 11 : i64} {
  func.func @kernel(%arg0: memref<128x128xbf16, #tpu.memory_space<vmem>>, %arg1: memref<128x32xbf16, #tpu.memory_space<vmem>>, %arg2: memref<32x128xbf16, #tpu.memory_space<vmem>>, %arg3: memref<128x128xbf16, #tpu.memory_space<vmem>>, %arg4: memref<128x128xf32, #tpu.memory_space<vmem>>) attributes {dimension_semantics = [], scalar_prefetch = 0 : i64, scratch_operands = 0 : i64, tpu.core_type = #tpu.core_type<tc>} {
    %c0 = arith.constant 0 : index
    %c0_0 = arith.constant 0 : index
    %0 = vector.load %arg0[%c0, %c0_0] : memref<128x128xbf16, #tpu.memory_space<vmem>>, vector<128x128xbf16>
    %c0_1 = arith.constant 0 : index
    %c0_2 = arith.constant 0 : index
    %1 = vector.load %arg1[%c0_1, %c0_2] : memref<128x32xbf16, #tpu.memory_space<vmem>>, vector<128x32xbf16>
    %c0_3 = arith.constant 0 : index
    %c0_4 = arith.constant 0 : index
    %2 = vector.load %arg2[%c0_3, %c0_4] : memref<32x128xbf16, #tpu.memory_space<vmem>>, vector<32x128xbf16>
    %cst = arith.constant dense<0.000000e+00> : vector<128x128xf32>
    %3 = tpu.matmul %1, %2, %cst {dimension_numbers = #tpu.dot_dimension_numbers<[1], [0], [0], [1], [0, 0, 1, 1], [], []>} : vector<128x32xbf16>, vector<32x128xbf16>, vector<128x128xf32> -> vector<128x128xf32>
    %4 = arith.truncf %3 : vector<128x128xf32> to vector<128x128xbf16>
    %cst_5 = arith.constant dense<0.000000e+00> : vector<128x128xf32>
    %5 = tpu.matmul %0, %4, %cst_5 {dimension_numbers = #tpu.dot_dimension_numbers<[1], [0], [0], [1], [0, 0, 1, 1], [], []>} : vector<128x128xbf16>, vector<128x128xbf16>, vector<128x128xf32> -> vector<128x128xf32>
    %cst_6 = arith.constant 0.000000e+00 : f32
    %6 = vector.broadcast %cst_6 : f32 to vector<128x128xf32>
    %7 = arith.maximumf %5, %6 : vector<128x128xf32>
    %8 = arith.truncf %7 : vector<128x128xf32> to vector<128x128xbf16>
    %c0_7 = arith.constant 0 : index
    %c0_8 = arith.constant 0 : index
    %9 = vector.load %arg3[%c0_7, %c0_8] : memref<128x128xbf16, #tpu.memory_space<vmem>>, vector<128x128xbf16>
    %cst_9 = arith.constant dense<0.000000e+00> : vector<128x128xf32>
    %10 = tpu.matmul %8, %9, %cst_9 {dimension_numbers = #tpu.dot_dimension_numbers<[1], [0], [0], [1], [0, 0, 1, 1], [], []>} : vector<128x128xbf16>, vector<128x128xbf16>, vector<128x128xf32> -> vector<128x128xf32>
    %11 = arith.truncf %10 : vector<128x128xf32> to vector<128x128xbf16>
    %cst_10 = arith.constant dense<0.000000e+00> : vector<128x128xf32>
    %12 = tpu.matmul %0, %11, %cst_10 {dimension_numbers = #tpu.dot_dimension_numbers<[1], [0], [0], [1], [0, 0, 1, 1], [], []>} : vector<128x128xbf16>, vector<128x128xbf16>, vector<128x128xf32> -> vector<128x128xf32>
    %cst_11 = arith.constant 0.000000e+00 : f32
    %13 = vector.broadcast %cst_11 : f32 to vector<128x128xf32>
    %14 = arith.maximumf %12, %13 : vector<128x128xf32>
    %c0_12 = arith.constant 0 : index
    %c0_13 = arith.constant 0 : index
    %15 = vector.load %arg4[%c0_12, %c0_13] : memref<128x128xf32, #tpu.memory_space<vmem>>, vector<128x128xf32>
    tpu.vector_store %arg4[%c0_12, %c0_13], %14 {strides = array<i32>} : memref<128x128xf32, #tpu.memory_space<vmem>>, vector<128x128xf32>,
    return
  }
}

</mosaic_0001>

<bundles_post_ra>
// kernel: tpu_custom_call.1
= control target key start
LH: loop header
LB: loop body
LE: loop exit
PB: predicated region body
PF: predicated region fallthrough
CT: control target
= control target key end

     0   :  { %9 = vsyncpa [#allocation3], 0  ;;  %s1184_s0 = inlined_call_operand.vmem [shape: bf16[128,128], index: 0, kind: input, shape index: {}]   ;;  %s1185_s1 = inlined_call_operand.vmem [shape: bf16[128,32], index: 1, kind: input, shape index: {}]   ;;  %s1186_s2 = inlined_call_operand.vmem [shape: bf16[32,128], index: 2, kind: input, shape index: {}]   ;;  %s1187_s3 = inlined_call_operand.hbm [shape: bf16[128,128], index: 3, kind: input, shape index: {}]   ;;  %s1188_s4 = inlined_call_operand.hbm [shape: f32[128,128], index: 4, kind: output, shape index: {}]  }
   0x1   :  { %10 = vsyncpa [#allocation4], 0  ;;  %s1039_s15 = smov [#allocation2]   ;;  %s991_s19 = scalar_lea.hbm %s1187_s3, 1024 }
   0x2   :  { %s22_s16 = sshll.u32 %s1039_s15, 4  ;;  %p992_p0 = scmp.ne.s32.totalorder %s1187_s3, %s991_s19  ;;  %s23_s16 = int_to_ptr.vmem [resolvable:$true] %s22_s16 }
   0x3   :  { %p995_p1 = scmp.lt.u32.totalorder %s991_s19, %s1187_s3 }
   0x5   :  { %p997_p2 = pnand %p995_p1, %p992_p0 }
   0x7   :  { %1000 = shalt.err (!%p997_p2)
}
   0x8   :  { %s1001_s24 = scalar_lea.vmem %s23_s16, 1024  ;;  %p1006_p4 = scmp.lt.s32.totalorder %s23_s16, %s23_s16 }
   0x9   :  { %p1002_p3 = scmp.ne.s32.totalorder %s23_s16, %s1001_s24  ;;  %p1007_p5 = scmp.lt.s32.totalorder %s1001_s24, %s1001_s24 }
   0xb   :  { %p1008_p6 = por %p1007_p5, %p1006_p4 }
   0xd   :  { %p1009_p7 = pnand %p1008_p6, %p1002_p3 }
   0xf   :  { %1012 = shalt.err (!%p1009_p7)
}
  0x10   :  { %s1040_s25 = smov 64   ;;  %s1041_s26 = smov 4  }
  0x11   :  { %28 = dma.hbm_to_vmem [thread:$0]  %s1187_s3, 1024, %s23_s16, [#allocation3], %s1040_s25, %s1040_s25, %s1041_s26  }
  0x12   :  { %1035 = dma.done.wait [#allocation3], 1024  }
  0x13   :  { %1036 = vsyncadd [#allocation3], 4294966272  ;;  %v965_v0 = vld [vmem:[%s1186_s2] sm:$0xff]   ;;  %v966_v1 = vld [vmem:[%s1186_s2 + $0x8] sm:$0xff]   ;;  %vm121_vm0 = vcmask 261120  }
  0x14   :  { %827 = vmatprep.subr.bf16.mxu0 %v965_v0  ;;  %v967_v2 = vld [vmem:[%s1185_s1] sm:$0xff]   ;;  %v968_v3 = vld [vmem:[%s1185_s1 + $0x8] sm:$0xff]   ;;  %v969_v4 = vld [vmem:[%s1185_s1 + $0x10] sm:$0xff]  }
  0x15   :  { %828 = vmatpush3.bf16.msra.mxu0 %v965_v0  ;;  %831 = vmatprep.mubr.msk.bf16.mxu0 %vm121_vm0, %v967_v2  ;;  %v970_v5 = vld [vmem:[%s1185_s1 + $0x18] sm:$0xff]   ;;  %v971_v6 = vld [vmem:[%s1185_s1 + $0x20] sm:$0xff]   ;;  %v972_v7 = vld [vmem:[%s1185_s1 + $0x28] sm:$0xff]  }
  0x16   :  { %829 = vmatprep.subr.bf16.mxu0 %v966_v1  ;;  %v973_v8 = vld [vmem:[%s1185_s1 + $0x30] sm:$0xff]   ;;  %v974_v9 = vld [vmem:[%s1185_s1 + $0x38] sm:$0xff]   ;;  %v1123_v10 = vld [vmem:[%s1184_s0] sm:$0xff]  }
  0x17   :  { %863 = vmatprep.mubr.bf16.mxu1 %v1123_v10  ;;  %v983_v11 = vld [vmem:[#allocation2] sm:$0xff]   ;;  %v984_v12 = vld [vmem:[#allocation2 + $0x8] sm:$0xff]   ;;  %v985_v13 = vld [vmem:[#allocation2 + $0x10] sm:$0xff]  }
  0x18   :  { %v986_v14 = vld [vmem:[#allocation2 + $0x18] sm:$0xff]   ;;  %v987_v15 = vld [vmem:[#allocation2 + $0x20] sm:$0xff]   ;;  %v988_v16 = vld [vmem:[#allocation2 + $0x28] sm:$0xff]  }
  0x19   :  { %830 = vmatpush3.bf16.msra.mxu0 %v966_v1  ;;  %v1129_v41 = vld [vmem:[%s1184_s0 + $0x8] sm:$0xff]   ;;  %v977_v42 = vld [vmem:[%s1184_s0 + $0x10] sm:$0xff]   ;;  %v1138_v43 = vld [vmem:[%s1184_s0 + $0x18] sm:$0xff]  }
  0x1a   :  { %879 = vmatprep.subr.bf16.mxu0 %v983_v11  ;;  %v1143_v44 = vld [vmem:[%s1184_s0 + $0x20] sm:$0xff]   ;;  %v1150_v45 = vld [vmem:[%s1184_s0 + $0x28] sm:$0xff]   ;;  %v1155_v46 = vld [vmem:[%s1184_s0 + $0x30] sm:$0xff]  }
  0x1b   :  { %v1162_v47 = vld [vmem:[%s1184_s0 + $0x38] sm:$0xff]   ;;  %v989_v48 = vld [vmem:[#allocation2 + $0x30] sm:$0xff]   ;;  %s1042_s0 = smov [#allocation5]  }
  0x1c   :  { %832 = vmatmul.mubr.msk.bf16.vlgmr.msra.gmra.mrb[0].mxu0 %vm121_vm0, %v968_v3  ;;  %v990_v49 = vld [vmem:[#allocation2 + $0x38] sm:$0xff]   ;;  %s723_s9 = sshll.u32 %s1042_s0, 4  ;;  %s724_s9 = int_to_ptr.vmem [resolvable:$true] %s723_s9 }
  0x1d   :  { %835 = vmatprep.mubr.msk.bf16.mxu0 %vm121_vm0, %v969_v4  ;;  %880 = vmatpush3.bf16.msra.mxu0 %v983_v11  ;;  %s1013_s10 = scalar_lea.vmem %s724_s9, 2048  ;;  %p1018_p9 = scmp.lt.s32.totalorder %s724_s9, %s724_s9 }
  0x1e   :  { %881 = vmatprep.subr.bf16.mxu0 %v984_v12  ;;  %p1014_p8 = scmp.ne.s32.totalorder %s724_s9, %s1013_s10  ;;  %p1019_p10 = scmp.lt.s32.totalorder %s1013_s10, %s1013_s10 }
  0x20   :  { %p1020_p11 = por %p1019_p10, %p1018_p9 }
  0x21   :  { %882 = vmatpush3.bf16.msra.mxu0 %v984_v12 }
  0x22   :  { %883 = vmatprep.subr.bf16.mxu0 %v985_v13  ;;  %p1021_p12 = pnand %p1020_p11, %p1014_p8 }
  0x24   :  { %836 = vmatmul.mubr.msk.bf16.gmra.mrb[4].mxu0 %vm121_vm0, %v970_v5 }
  0x25   :  { %839 = vmatprep.mubr.msk.bf16.mxu0 %vm121_vm0, %v971_v6  ;;  %884 = vmatpush3.bf16.msra.mxu0 %v985_v13 }
  0x26   :  { %885 = vmatprep.subr.bf16.mxu0 %v986_v14 }
  0x29   :  { %886 = vmatpush3.bf16.msra.mxu0 %v986_v14 }
  0x2a   :  { %887 = vmatprep.subr.bf16.mxu0 %v987_v15 }
  0x2c   :  { %840 = vmatmul.mubr.msk.bf16.gmra.mrb[8].mxu0 %vm121_vm0, %v972_v7 }
  0x2d   :  { %843 = vmatprep.mubr.msk.bf16.mxu0 %vm121_vm0, %v973_v8  ;;  %888 = vmatpush3.bf16.msra.mxu0 %v987_v15 }
  0x2e   :  { %889 = vmatprep.subr.bf16.mxu0 %v988_v16 }
  0x31   :  { %890 = vmatpush3.bf16.msra.mxu0 %v988_v16 }
  0x32   :  { %891 = vmatprep.subr.bf16.mxu0 %v989_v48 }
  0x34   :  { %844 = vmatmul.mubr.msk.bf16.gmra.mrb[12].mxu0 %vm121_vm0, %v974_v9 }
  0x35   :  { %892 = vmatpush3.bf16.msra.mxu0 %v989_v48 }
  0x36   :  { %893 = vmatprep.subr.bf16.mxu0 %v990_v49 }
  0x39   :  { %894 = vmatpush3.bf16.msra.mxu0 %v990_v49 }
  0xef   :  { %v833_v17 = vpop.f32.mrb[0].mxu0 }
  0xf0   :  { %v180_v18 = vpop.f32.mrb[1].mxu0 }
  0xf1   :  { %v834_v19 = vpop.f32.mrb[2].mxu0 }
  0xf2   :  { %v244_v20 = vpack.c.bf16 %v834_v19, %v833_v17  ;;  %v183_v21 = vpop.f32.mrb[3].mxu0 }
  0xf3   :  { %v243_v22 = vpack.c.bf16 %v183_v21, %v180_v18 }
  0xf5   :  { %847 = vmatprep.subr.bf16.mxu1 %v243_v22 }
  0xf6   :  { %848 = vmatpush3.bf16.msra.mxu1 %v243_v22 }
  0xf7   :  { %v837_v23 = vpop.f32.mrb[4].mxu0  ;;  %849 = vmatprep.subr.bf16.mxu1 %v244_v20 }
  0xf8   :  { %v196_v24 = vpop.f32.mrb[5].mxu0 }
  0xf9   :  { %v838_v25 = vpop.f32.mrb[6].mxu0 }
  0xfa   :  { %v246_v26 = vpack.c.bf16 %v838_v25, %v837_v23  ;;  %v199_v27 = vpop.f32.mrb[7].mxu0  ;;  %850 = vmatpush3.bf16.msra.mxu1 %v244_v20 }
  0xfb   :  { %v245_v28 = vpack.c.bf16 %v199_v27, %v196_v24 }
  0xfd   :  { %851 = vmatprep.subr.bf16.mxu1 %v245_v28 }
  0xfe   :  { %852 = vmatpush3.bf16.msra.mxu1 %v245_v28 }
  0xff   :  { %v841_v29 = vpop.f32.mrb[8].mxu0  ;;  %853 = vmatprep.subr.bf16.mxu1 %v246_v26 }
 0x100   :  { %v212_v30 = vpop.f32.mrb[9].mxu0 }
 0x101   :  { %v842_v31 = vpop.f32.mrb[10].mxu0 }
 0x102   :  { %v248_v32 = vpack.c.bf16 %v842_v31, %v841_v29  ;;  %v215_v33 = vpop.f32.mrb[11].mxu0  ;;  %854 = vmatpush3.bf16.msra.mxu1 %v246_v26 }
 0x103   :  { %v247_v34 = vpack.c.bf16 %v215_v33, %v212_v30 }
 0x105   :  { %855 = vmatprep.subr.bf16.mxu1 %v247_v34 }
 0x106   :  { %856 = vmatpush3.bf16.msra.mxu1 %v247_v34 }
 0x107   :  { %v845_v35 = vpop.f32.mrb[12].mxu0  ;;  %857 = vmatprep.subr.bf16.mxu1 %v248_v32 }
 0x108   :  { %v228_v36 = vpop.f32.mrb[13].mxu0 }
 0x109   :  { %v846_v37 = vpop.f32.mrb[14].mxu0 }
 0x10a   :  { %v250_v38 = vpack.c.bf16 %v846_v37, %v845_v35  ;;  %v231_v39 = vpop.f32.mrb[15].mxu0  ;;  %858 = vmatpush3.bf16.msra.mxu1 %v248_v32 }
 0x10b   :  { %v249_v40 = vpack.c.bf16 %v231_v39, %v228_v36 }
 0x10d   :  { %859 = vmatprep.subr.bf16.mxu1 %v249_v40 }
 0x10e   :  { %860 = vmatpush3.bf16.msra.mxu1 %v249_v40 }
 0x10f   :  { %861 = vmatprep.subr.bf16.mxu1 %v250_v38 }
 0x112   :  { %862 = vmatpush3.bf16.msra.mxu1 %v250_v38 }
 0x115   :  { %864 = vmatmul.mubr.bf16.vlgmr.msra.gmra.mrb[0].mxu1 %v1129_v41 }
 0x116   :  { %867 = vmatprep.mubr.bf16.mxu1 %v977_v42 }
 0x11d   :  { %868 = vmatmul.mubr.bf16.gmra.mrb[4].mxu1 %v1138_v43 }
 0x11e   :  { %871 = vmatprep.mubr.bf16.mxu1 %v1143_v44 }
 0x125   :  { %872 = vmatmul.mubr.bf16.gmra.mrb[8].mxu1 %v1150_v45 }
 0x126   :  { %875 = vmatprep.mubr.bf16.mxu1 %v1155_v46 }
 0x12d   :  { %876 = vmatmul.mubr.bf16.gmra.mrb[12].mxu1 %v1162_v47 }
 0x12e   :  { %931 = vmatprep.mubr.bf16.mxu1 %v977_v42 }
 0x1e8   :  { %v865_v50 = vpop.f32.mrb[0].mxu1 }
 0x1e9   :  { %v333_v51 = vpop.f32.mrb[1].mxu1  ;;  %v398_v53 = vmax.f32 %v865_v50, 0.0 }
 0x1ea   :  { %v866_v52 = vpop.f32.mrb[2].mxu1  ;;  %v396_v56 = vmax.f32 %v333_v51, 0.0 }
 0x1eb   :  { %v399_v54 = vmax.f32 %v866_v52, 0.0  ;;  %v336_v55 = vpop.f32.mrb[3].mxu1 }
 0x1ec   :  { %v397_v57 = vmax.f32 %v336_v55, 0.0 }
 0x1ed   :  { %v413_v58 = vpack.c.bf16 %v399_v54, %v398_v53 }
 0x1ee   :  { %v412_v59 = vpack.c.bf16 %v397_v57, %v396_v56 }
 0x1f0   :  { %v869_v60 = vpop.f32.mrb[4].mxu1  ;;  %895 = vmatprep.mubr.bf16.mxu0 %v412_v59 }
 0x1f1   :  { %v349_v61 = vpop.f32.mrb[5].mxu1  ;;  %896 = vmatmul.mubr.bf16.vlgmr.msra.gmra.mrb[16].mxu0 %v413_v58  ;;  %v402_v63 = vmax.f32 %v869_v60, 0.0 }
 0x1f2   :  { %v870_v62 = vpop.f32.mrb[6].mxu1  ;;  %v400_v2 = vmax.f32 %v349_v61, 0.0 }
 0x1f3   :  { %v403_v0 = vmax.f32 %v870_v62, 0.0  ;;  %v352_v1 = vpop.f32.mrb[7].mxu1 }
 0x1f4   :  { %v401_v3 = vmax.f32 %v352_v1, 0.0 }
 0x1f5   :  { %v415_v4 = vpack.c.bf16 %v403_v0, %v402_v63 }
 0x1f6   :  { %v414_v5 = vpack.c.bf16 %v401_v3, %v400_v2 }
 0x1f8   :  { %v873_v6 = vpop.f32.mrb[8].mxu1  ;;  %899 = vmatprep.mubr.bf16.mxu0 %v414_v5 }
 0x1f9   :  { %v365_v7 = vpop.f32.mrb[9].mxu1  ;;  %900 = vmatmul.mubr.bf16.gmra.mrb[20].mxu0 %v415_v4  ;;  %v406_v9 = vmax.f32 %v873_v6, 0.0 }
 0x1fa   :  { %v874_v8 = vpop.f32.mrb[10].mxu1  ;;  %v404_v13 = vmax.f32 %v365_v7, 0.0 }
 0x1fb   :  { %v407_v11 = vmax.f32 %v874_v8, 0.0  ;;  %v368_v12 = vpop.f32.mrb[11].mxu1 }
 0x1fc   :  { %v405_v14 = vmax.f32 %v368_v12, 0.0 }
 0x1fd   :  { %v417_v15 = vpack.c.bf16 %v407_v11, %v406_v9 }
 0x1fe   :  { %v416_v16 = vpack.c.bf16 %v405_v14, %v404_v13 }
 0x200   :  { %v877_v17 = vpop.f32.mrb[12].mxu1  ;;  %903 = vmatprep.mubr.bf16.mxu0 %v416_v16 }
 0x201   :  { %v381_v18 = vpop.f32.mrb[13].mxu1  ;;  %904 = vmatmul.mubr.bf16.gmra.mrb[24].mxu0 %v417_v15  ;;  %v410_v20 = vmax.f32 %v877_v17, 0.0 }
 0x202   :  { %v878_v19 = vpop.f32.mrb[14].mxu1  ;;  %v408_v23 = vmax.f32 %v381_v18, 0.0 }
 0x203   :  { %v411_v21 = vmax.f32 %v878_v19, 0.0  ;;  %v384_v22 = vpop.f32.mrb[15].mxu1 }
 0x204   :  { %v409_v24 = vmax.f32 %v384_v22, 0.0 }
 0x205   :  { %v419_v25 = vpack.c.bf16 %v411_v21, %v410_v20 }
 0x206   :  { %v418_v26 = vpack.c.bf16 %v409_v24, %v408_v23 }
 0x208   :  { %907 = vmatprep.mubr.bf16.mxu0 %v418_v26 }
 0x209   :  { %908 = vmatmul.mubr.bf16.gmra.mrb[28].mxu0 %v419_v25 }
 0x20a   :  { %927 = vmatprep.mubr.bf16.mxu0 %v1123_v10 }
 0x2c4   :  { %v897_v27 = vpop.f32.mrb[16].mxu0 }
 0x2c5   :  { %v518_v28 = vpop.f32.mrb[17].mxu0 }
 0x2c6   :  { %v898_v29 = vpop.f32.mrb[18].mxu0 }
 0x2c7   :  { %v582_v30 = vpack.c.bf16 %v898_v29, %v897_v27  ;;  %v521_v31 = vpop.f32.mrb[19].mxu0 }
 0x2c8   :  { %v581_v32 = vpack.c.bf16 %v521_v31, %v518_v28 }
 0x2ca   :  { %911 = vmatprep.subr.bf16.mxu0 %v581_v32  ;;  %943 = vmatprep.subr.bf16.mxu1 %v581_v32 }
 0x2cb   :  { %912 = vmatpush3.bf16.msra.mxu0 %v581_v32  ;;  %951 = vmatpush3.bf16.msra.mxu1 %v581_v32 }
 0x2cc   :  { %v901_v33 = vpop.f32.mrb[20].mxu0  ;;  %913 = vmatprep.subr.bf16.mxu0 %v582_v30  ;;  %944 = vmatprep.subr.bf16.mxu1 %v582_v30 }
 0x2cd   :  { %v534_v34 = vpop.f32.mrb[21].mxu0 }
 0x2ce   :  { %v902_v35 = vpop.f32.mrb[22].mxu0 }
 0x2cf   :  { %v584_v36 = vpack.c.bf16 %v902_v35, %v901_v33  ;;  %v537_v37 = vpop.f32.mrb[23].mxu0  ;;  %914 = vmatpush3.bf16.msra.mxu0 %v582_v30  ;;  %952 = vmatpush3.bf16.msra.mxu1 %v582_v30 }
 0x2d0   :  { %v583_v10 = vpack.c.bf16 %v537_v37, %v534_v34 }
 0x2d2   :  { %915 = vmatprep.subr.bf16.mxu0 %v583_v10  ;;  %945 = vmatprep.subr.bf16.mxu1 %v583_v10 }
 0x2d3   :  { %916 = vmatpush3.bf16.msra.mxu0 %v583_v10  ;;  %953 = vmatpush3.bf16.msra.mxu1 %v583_v10 }
 0x2d4   :  { %v905_v38 = vpop.f32.mrb[24].mxu0  ;;  %917 = vmatprep.subr.bf16.mxu0 %v584_v36  ;;  %946 = vmatprep.subr.bf16.mxu1 %v584_v36 }
 0x2d5   :  { %v550_v39 = vpop.f32.mrb[25].mxu0 }
 0x2d6   :  { %v906_v40 = vpop.f32.mrb[26].mxu0 }
 0x2d7   :  { %v586_v42 = vpack.c.bf16 %v906_v40, %v905_v38  ;;  %v553_v48 = vpop.f32.mrb[27].mxu0  ;;  %918 = vmatpush3.bf16.msra.mxu0 %v584_v36  ;;  %954 = vmatpush3.bf16.msra.mxu1 %v584_v36 }
 0x2d8   :  { %v585_v49 = vpack.c.bf16 %v553_v48, %v550_v39 }
 0x2da   :  { %919 = vmatprep.subr.bf16.mxu0 %v585_v49  ;;  %947 = vmatprep.subr.bf16.mxu1 %v585_v49 }
 0x2db   :  { %920 = vmatpush3.bf16.msra.mxu0 %v585_v49  ;;  %955 = vmatpush3.bf16.msra.mxu1 %v585_v49 }
 0x2dc   :  { %v909_v50 = vpop.f32.mrb[28].mxu0  ;;  %921 = vmatprep.subr.bf16.mxu0 %v586_v42  ;;  %948 = vmatprep.subr.bf16.mxu1 %v586_v42 }
 0x2dd   :  { %v566_v51 = vpop.f32.mrb[29].mxu0 }
 0x2de   :  { %v910_v52 = vpop.f32.mrb[30].mxu0 }
 0x2df   :  { %v588_v53 = vpack.c.bf16 %v910_v52, %v909_v50  ;;  %v569_v54 = vpop.f32.mrb[31].mxu0  ;;  %922 = vmatpush3.bf16.msra.mxu0 %v586_v42  ;;  %956 = vmatpush3.bf16.msra.mxu1 %v586_v42 }
 0x2e0   :  { %v587_v55 = vpack.c.bf16 %v569_v54, %v566_v51 }
 0x2e2   :  { %923 = vmatprep.subr.bf16.mxu0 %v587_v55  ;;  %949 = vmatprep.subr.bf16.mxu1 %v587_v55 }
 0x2e3   :  { %924 = vmatpush3.bf16.msra.mxu0 %v587_v55  ;;  %957 = vmatpush3.bf16.msra.mxu1 %v587_v55 }
 0x2e4   :  { %925 = vmatprep.subr.bf16.mxu0 %v588_v53  ;;  %950 = vmatprep.subr.bf16.mxu1 %v588_v53 }
 0x2e7   :  { %926 = vmatpush3.bf16.msra.mxu0 %v588_v53  ;;  %958 = vmatpush3.bf16.msra.mxu1 %v588_v53 }
 0x2ea   :  { %932 = vmatmul.mubr.bf16.vlgmr.msra.gmra.mrb[16].mxu1 %v1138_v43  ;;  %928 = vmatmul.mubr.bf16.vlgmr.msra.gmra.mrb[32].mxu0 %v1129_v41 }
 0x2eb   :  { %935 = vmatprep.mubr.bf16.mxu1 %v1143_v44 }
 0x2f2   :  { %936 = vmatmul.mubr.bf16.gmra.mrb[20].mxu1 %v1150_v45 }
 0x2f3   :  { %939 = vmatprep.mubr.bf16.mxu1 %v1155_v46 }
 0x2fa   :  { %940 = vmatmul.mubr.bf16.gmra.mrb[24].mxu1 %v1162_v47 }
 0x3bd   :  { %v933_v56 = vpop.f32.mrb[16].mxu1  ;;  %v929_v57 = vpop.f32.mrb[32].mxu0 }
 0x3be   :  { %v692_v58 = vmax.f32 %v933_v56, 0.0  ;;  %v639_v59 = vpop.f32.mrb[17].mxu1  ;;  %v688_v60 = vmax.f32 %v929_v57, 0.0  ;;  %v623_v61 = vpop.f32.mrb[33].mxu0 }
 0x3bf   :  { %v690_v62 = vmax.f32 %v639_v59, 0.0  ;;  %v934_v63 = vpop.f32.mrb[18].mxu1  ;;  %v686_v0 = vmax.f32 %v623_v61, 0.0  ;;  %v930_v43 = vpop.f32.mrb[34].mxu0 }
 0x3c0   :  { %708 = vst [vmem:[#allocation5 + $0x30] sm:$0xff] %v692_v58  ;;  %v693_v41 = vmax.f32 %v934_v63, 0.0  ;;  %v642_v1 = vpop.f32.mrb[19].mxu1  ;;  %704 = vst [vmem:[#allocation5 + $0x10] sm:$0xff] %v688_v60  ;;  %v689_v44 = vmax.f32 %v930_v43, 0.0  ;;  %v626_v45 = vpop.f32.mrb[35].mxu0 }
 0x3c1   :  { %706 = vst [vmem:[#allocation5 + $0x20] sm:$0xff] %v690_v62  ;;  %v691_v46 = vmax.f32 %v642_v1, 0.0  ;;  %702 = vst [vmem:[#allocation5] sm:$0xff] %v686_v0  ;;  %v687_v47 = vmax.f32 %v626_v45, 0.0 }
 0x3c2   :  { %709 = vst [vmem:[#allocation5 + $0x38] sm:$0xff] %v693_v41  ;;  %705 = vst [vmem:[#allocation5 + $0x18] sm:$0xff] %v689_v44 }
 0x3c3   :  { %707 = vst [vmem:[#allocation5 + $0x28] sm:$0xff] %v691_v46  ;;  %703 = vst [vmem:[#allocation5 + $0x8] sm:$0xff] %v687_v47 }
 0x3c5   :  { %v937_v2 = vpop.f32.mrb[20].mxu1 }
 0x3c6   :  { %v696_v3 = vmax.f32 %v937_v2, 0.0  ;;  %v655_v4 = vpop.f32.mrb[21].mxu1 }
 0x3c7   :  { %v694_v5 = vmax.f32 %v655_v4, 0.0  ;;  %v938_v6 = vpop.f32.mrb[22].mxu1 }
 0x3c8   :  { %712 = vst [vmem:[#allocation5 + $0x50] sm:$0xff] %v696_v3  ;;  %v697_v7 = vmax.f32 %v938_v6, 0.0  ;;  %v658_v8 = vpop.f32.mrb[23].mxu1 }
 0x3c9   :  { %710 = vst [vmem:[#allocation5 + $0x40] sm:$0xff] %v694_v5  ;;  %v695_v9 = vmax.f32 %v658_v8, 0.0 }
 0x3ca   :  { %713 = vst [vmem:[#allocation5 + $0x58] sm:$0xff] %v697_v7 }
 0x3cb   :  { %711 = vst [vmem:[#allocation5 + $0x48] sm:$0xff] %v695_v9 }
 0x3cd   :  { %v941_v11 = vpop.f32.mrb[24].mxu1 }
 0x3ce   :  { %v700_v12 = vmax.f32 %v941_v11, 0.0  ;;  %v671_v13 = vpop.f32.mrb[25].mxu1 }
 0x3cf   :  { %v698_v14 = vmax.f32 %v671_v13, 0.0  ;;  %v942_v15 = vpop.f32.mrb[26].mxu1 }
 0x3d0   :  { %716 = vst [vmem:[#allocation5 + $0x70] sm:$0xff] %v700_v12  ;;  %v701_v16 = vmax.f32 %v942_v15, 0.0  ;;  %v674_v17 = vpop.f32.mrb[27].mxu1 }
 0x3d1   :  { %714 = vst [vmem:[#allocation5 + $0x60] sm:$0xff] %v698_v14  ;;  %v699_v18 = vmax.f32 %v674_v17, 0.0 }
 0x3d2   :  { %717 = vst [vmem:[#allocation5 + $0x78] sm:$0xff] %v701_v16 }
 0x3d3   :  { %715 = vst [vmem:[#allocation5 + $0x68] sm:$0xff] %v699_v18 }
 0x3d4   :  { %1024 = shalt.err (!%p1021_p12)
}
 0x3d5   :  { %s1025_s12 = scalar_lea.hbm %s1188_s4, 2048 }
 0x3d6   :  { %p1026_p13 = scmp.ne.s32.totalorder %s1188_s4, %s1025_s12  ;;  %p1029_p0 = scmp.lt.u32.totalorder %s1025_s12, %s1188_s4 }
 0x3d8   :  { %p1031_p1 = pnand %p1029_p0, %p1026_p13 }
 0x3da   :  { %1034 = shalt.err (!%p1031_p1)
}
 0x3db   :  { %s1043_s17 = smov 128   ;;  %s1044_s18 = smov 8  }
 0x3dc   :  { %729 = dma.vmem_to_hbm [thread:$0]  %s724_s9, 2048, %s1188_s4, [#allocation4], %s1043_s17, %s1043_s17, %s1044_s18  }
 0x3dd   :  { %1037 = dma.done.wait [#allocation4], 2048  }
 0x3de   :  { %1038 = vsyncadd [#allocation4], 4294965248 }
 0x3df   :  { %733 = vsyncpa [#allocation3], 1 }
 0x3e0   :  { %734 = vsyncpa [#allocation4], 1 }

</bundles_post_ra>
